<compile_context>
chip_gen: v5e
topology: v5e:2x2
jax: 0.10.0
libtpu: 0.0.40
codegen_flags: <defaults>
</compile_context>

<pallas_src>
import math

import jax
import jax.numpy as jnp
from jax.experimental import pallas as pl
from jax.experimental.pallas import tpu as pltpu


def _global_mvn_kernel(x_ref, stats_ref, o_ref):
    # x_ref: (tile_rows, W); stats_ref: (2, W) -- row 0 = mean, row 1 = 1/std.
    mean = stats_ref[0:1, :]
    inv_std = stats_ref[1:2, :]
    x = x_ref[...].astype(mean.dtype)
    o_ref[...] = ((x - mean) * inv_std).astype(o_ref.dtype)


def _sublane_multiple(dtype) -> int:
    # f32 -> 8 rows/vreg, bf16 -> 16, int8/fp8 -> 32 (sub-32-bit packs along sublanes).
    itemsize = jnp.dtype(dtype).itemsize
    return 8 * max(1, 4 // itemsize)


def _vmem_limit_bytes() -> int:
    # Generation-aware scoped VMEM limit: ~3/4 of physical capacity.
    #   v7x: 64 MiB physical -> 48 MiB;  v5e/v6e: 128 MiB physical -> 96 MiB.
    try:
        cap = pltpu.get_tpu_info().vmem_capacity_bytes
    except Exception:  # query unavailable -> conservative value that fits every chip
        cap = 64 * 1024 * 1024
    return int(min(96 * 1024 * 1024, (cap * 3) // 4))


def _mvn_pallas_2d(x2d: jax.Array, stats2d: jax.Array, *, target_tile_bytes: int) -> jax.Array:
    """Run (x - mean) * inv_std on a lane-dense (rows, W) slab, W % 128 == 0."""
    n_rows, W = x2d.shape
    itemsize = jnp.dtype(x2d.dtype).itemsize
    sub = _sublane_multiple(x2d.dtype)

    vmem_limit = _vmem_limit_bytes()
    # Double-buffered input + output ~= 4x the tile bytes; keep headroom.
    tile_budget = min(target_tile_bytes, max(64 * 1024, (vmem_limit - (1 << 20)) // 4))

    tile_rows = max(sub, tile_budget // max(1, W * itemsize))
    tile_rows = max(sub, (tile_rows // sub) * sub)
    if tile_rows >= n_rows:
        tile_rows = n_rows  # single block == full array dims (always legal)

    grid = (pl.cdiv(n_rows, tile_rows),)

    n_elems = x2d.size
    cost = pl.CostEstimate(
        flops=2 * n_elems,
        transcendentals=0,
        bytes_accessed=2 * n_elems * itemsize
        + int(stats2d.size) * jnp.dtype(stats2d.dtype).itemsize,
    )

    return pl.pallas_call(
        _global_mvn_kernel,
        out_shape=jax.ShapeDtypeStruct((n_rows, W), x2d.dtype),
        grid_spec=pltpu.PrefetchScalarGridSpec(
            num_scalar_prefetch=0,
            grid=grid,
            in_specs=[
                pl.BlockSpec((tile_rows, W), lambda i: (i, 0)),
                pl.BlockSpec((2, W), lambda i: (0, 0)),  # fused mean / inv_std
            ],
            out_specs=pl.BlockSpec((tile_rows, W), lambda i: (i, 0)),
        ),
        compiler_params=pltpu.CompilerParams(
            # TODO(synk): on v7x, switch to pltpu.CORE_PARALLEL (and verify both
            # TensorCores are active in xprof) once validated on that target.
            dimension_semantics=(pltpu.PARALLEL,),
            vmem_limit_bytes=vmem_limit,
        ),
        cost_estimate=cost,
    )(x2d, stats2d)


def global_mvn_forward(features: jax.Array,
                       norm_means: jax.Array,
                       norm_stds: jax.Array,
                       *,
                       target_tile_bytes: int = 8 * 1024 * 1024) -> jax.Array:
    """Apply (features - means) / stds with a Pallas TPU kernel.

    features: (..., feature_dim); norm_means, norm_stds: (feature_dim,) f32 buffers.
    """
    orig_shape = features.shape
    feat_dim = orig_shape[-1]
    assert norm_means.shape == (feat_dim,)
    assert norm_stds.shape == (feat_dim,)

    # bf16 features -> compute natively in bf16 (fewer casts, half vreg pressure);
    # everything else computes in f32 (matches the PyTorch f32 buffers).
    compute_dtype = jnp.bfloat16 if features.dtype == jnp.bfloat16 else jnp.float32
    mean_c = norm_means.astype(jnp.float32).astype(compute_dtype)
    inv_std_c = (1.0 / norm_stds.astype(jnp.float32)).astype(compute_dtype)

    x2d = features.reshape(-1, feat_dim)
    n_rows = x2d.shape[0]
    if n_rows == 0 or feat_dim == 0:
        return features

    def _tail_jnp(xt):
        # Same math as the kernel so the two paths agree bit-for-bit.
        y = (xt.astype(compute_dtype) - mean_c) * inv_std_c
        return y.astype(features.dtype)

    # Lane-dense folding: fold k rows into the lane axis so the kernel's last
    # dim is a multiple of 128 (full-width vst instead of masked vst.msk).
    k = 128 // math.gcd(feat_dim, 128)
    n_main = (n_rows // k) * k

    if n_main == 0:
        # Fewer than k rows total: too small to be worth a kernel launch.
        return _tail_jnp(x2d).reshape(orig_shape)

    W = k * feat_dim
    x_main = x2d[:n_main].reshape(n_main // k, W)
    stats2d = jnp.stack([jnp.tile(mean_c, k), jnp.tile(inv_std_c, k)], axis=0)

    out_main = _mvn_pallas_2d(x_main, stats2d, target_tile_bytes=target_tile_bytes)
    out_main = out_main.reshape(n_main, feat_dim)

    if n_main == n_rows:
        out2d = out_main
    else:
        # <= k-1 leftover rows: finish them with plain jnp so the bulk of the
        # array stays on the lane-dense fast path.
        # TODO(synk): hot paths should pad n_rows to a multiple of k upstream to
        # avoid the concat copy entirely.
        out2d = jnp.concatenate([out_main, _tail_jnp(x2d[n_main:])], axis=0)

    return out2d.reshape(orig_shape)


if __name__ == "__main__":
    # GlobalMVN(feature_dim): buffers norm_means = zeros, norm_stds = ones at init.
    # Use deterministic non-trivial stats so the kernel math is exercised.
    batch, time, feature_dim = 2, 8, 32

    key = jax.random.PRNGKey(0)
    k_x, k_m, k_s = jax.random.split(key, 3)

    features = jax.random.normal(k_x, (batch, time, feature_dim), dtype=jnp.float32)
    norm_means = jax.random.normal(k_m, (feature_dim,), dtype=jnp.float32) * 0.5
    norm_stds = jax.random.uniform(k_s, (feature_dim,), dtype=jnp.float32,
                                   minval=0.5, maxval=2.0)

    out = jax.block_until_ready(global_mvn_forward(features, norm_means, norm_stds))
    ref = (features - norm_means) / norm_stds
    assert out.shape == features.shape
    assert out.dtype == features.dtype
    assert jnp.allclose(out, ref, rtol=1e-5, atol=1e-6)

    # fbank-like F=80 with a ragged row count: main rows go through the folded
    # lane-dense kernel, the leftover <k rows are finished with jnp.
    b2, t2, f2 = 3, 7, 80
    x2 = jax.random.normal(k_x, (b2, t2, f2), dtype=jnp.float32)
    m2 = jax.random.normal(k_m, (f2,), dtype=jnp.float32) * 0.1
    s2 = jax.random.uniform(k_s, (f2,), dtype=jnp.float32, minval=0.5, maxval=2.0)
    out2 = jax.block_until_ready(global_mvn_forward(x2, m2, s2))
    ref2 = (x2 - m2) / s2
    assert jnp.allclose(out2, ref2, rtol=1e-5, atol=1e-6)

    # bf16 path (native bf16 compute in the kernel).
    x3 = jax.random.normal(k_x, (4, 16, 128), dtype=jnp.float32).astype(jnp.bfloat16)
    m3 = jnp.zeros((128,), jnp.float32)
    s3 = jnp.full((128,), 2.0, jnp.float32)
    out3 = jax.block_until_ready(global_mvn_forward(x3, m3, s3))
    ref3 = ((x3.astype(jnp.float32) - m3) / s3).astype(jnp.bfloat16)
    assert out3.dtype == jnp.bfloat16
    assert jnp.allclose(out3.astype(jnp.float32), ref3.astype(jnp.float32),
                        rtol=2e-2, atol=2e-2)

    print("KERNEL_OK")
</pallas_src>

<mosaic_0001>
module attributes {stable_mosaic.version = 11 : i64} {
  func.func @_global_mvn_kernel(%arg0: i32, %arg1: memref<4x128xf32, #tpu.memory_space<vmem>>, %arg2: memref<2x128xf32, #tpu.memory_space<vmem>>, %arg3: memref<4x128xf32, #tpu.memory_space<vmem>>) attributes {dimension_semantics = [#tpu.dimension_semantics<parallel>], iteration_bounds = array<i64: 1>, scalar_prefetch = 0 : i64, scratch_operands = 0 : i64, tpu.core_type = #tpu.core_type<tc>, window_params = [{transform_indices = @transform_0, window_bounds = array<i64: 4, 128>}, {pipeline_mode = #tpu.pipeline_mode<synchronous>, transform_indices = @transform_1, window_bounds = array<i64: 2, 128>}, {transform_indices = @transform_2, window_bounds = array<i64: 4, 128>}]} {
    %c0 = arith.constant 0 : index
    %c0_0 = arith.constant 0 : index
    %0 = vector.load %arg2[%c0, %c0_0] : memref<2x128xf32, #tpu.memory_space<vmem>>, vector<1x128xf32>
    %c1 = arith.constant 1 : index
    %c0_1 = arith.constant 0 : index
    %1 = vector.load %arg2[%c1, %c0_1] : memref<2x128xf32, #tpu.memory_space<vmem>>, vector<1x128xf32>
    %c0_2 = arith.constant 0 : index
    %c0_3 = arith.constant 0 : index
    %2 = vector.load %arg1[%c0_2, %c0_3] : memref<4x128xf32, #tpu.memory_space<vmem>>, vector<4x128xf32>
    %3 = vector.broadcast %0 : vector<1x128xf32> to vector<4x128xf32>
    %4 = arith.subf %2, %3 : vector<4x128xf32>
    %5 = vector.broadcast %1 : vector<1x128xf32> to vector<4x128xf32>
    %6 = arith.mulf %4, %5 : vector<4x128xf32>
    %c0_4 = arith.constant 0 : index
    %c0_5 = arith.constant 0 : index
    %7 = vector.load %arg3[%c0_4, %c0_5] : memref<4x128xf32, #tpu.memory_space<vmem>>, vector<4x128xf32>
    tpu.vector_store %arg3[%c0_4, %c0_5], %6 {strides = array<i32>} : memref<4x128xf32, #tpu.memory_space<vmem>>, vector<4x128xf32>,
    return
  }
  func.func @transform_0(%arg0: i32) -> (i32, i32) {
    %c0_i32 = arith.constant 0 : i32
    %c0_i32_0 = arith.constant 0 : i32
    return %arg0, %c0_i32 : i32, i32
  }
  func.func @transform_1(%arg0: i32) -> (i32, i32) {
    %c0_i32 = arith.constant 0 : i32
    %c0_i32_0 = arith.constant 0 : i32
    %c0_i32_1 = arith.constant 0 : i32
    return %c0_i32, %c0_i32_0 : i32, i32
  }
  func.func @transform_2(%arg0: i32) -> (i32, i32) {
    %c0_i32 = arith.constant 0 : i32
    %c0_i32_0 = arith.constant 0 : i32
    return %arg0, %c0_i32 : i32, i32
  }
}

</mosaic_0001>

<bundles_post_ra>
// kernel: tpu_custom_call.1
= control target key start
LH: loop header
LB: loop body
LE: loop exit
PB: predicated region body
PF: predicated region fallthrough
CT: control target
= control target key end

     0   :  { %7 = vsyncpa [#allocation3], 0  ;;  %s176_s0 = inlined_call_operand.hbm [shape: f32[4,128], index: 0, kind: input, shape index: {}]   ;;  %s177_s1 = inlined_call_operand.hbm [shape: f32[2,128], index: 1, kind: input, shape index: {}]   ;;  %s178_s2 = inlined_call_operand.hbm [shape: f32[4,128], index: 2, kind: output, shape index: {}]  }
   0x1   :  { %8 = vsyncpa [#allocation6], 0 }
   0x2   :  { %9 = vsyncpa [#allocation4], 0  ;;  %s15_s11 = sshll.u32 %s176_s0, 4  ;;  %s149_s12 = smov [#allocation2]   ;;  %s16_s11 = int_to_ptr.hbm [resolvable:$true] %s15_s11 }
   0x3   :  { %s17_s13 = sshll.u32 %s149_s12, 4  ;;  %s26_s16 = sshll.u32 %s177_s1, 4  ;;  %s18_s13 = int_to_ptr.vmem [resolvable:$true] %s17_s13  ;;  %s27_s16 = int_to_ptr.hbm [resolvable:$true] %s26_s16 }
   0x4   :  { %20 = dma.hbm_to_vmem [thread:$0]  %s16_s11, 64, %s18_s13, [#allocation3]  }
   0x5   :  { %s150_s17 = smov [#allocation5]  }
   0x6   :  { %s28_s18 = sshll.u32 %s150_s17, 4  ;;  %s29_s18 = int_to_ptr.vmem [resolvable:$true] %s28_s18 }
   0x7   :  { %31 = dma.hbm_to_vmem [thread:$0]  %s27_s16, 32, %s29_s18, [#allocation6]  }
   0x8   :  { %143 = dma.done.wait [#allocation3], 64  }
   0x9   :  { %144 = vsyncadd [#allocation3], 4294967232 }
   0xa   :  { %145 = dma.done.wait [#allocation6], 32  }
   0xb   :  { %146 = vsyncadd [#allocation6], 4294967264  ;;  %v42_v0 = vld [vmem:[#allocation2] sm:$0xf]  ;;  %v69_v1 = vld [vmem:[#allocation5] ss:$0 sm:$0xff] }
   0xc   :  { %v70_v2 = vld [vmem:[#allocation5 + $0x1] ss:$0 sm:$0xff]  ;;  %s151_s0 = smov [#allocation7]   ;;  %s55_s22 = sshll.u32 %s178_s2, 4  ;;  %v44_v3 = vsub.f32 %v42_v0, %v69_v1  ;;  %s56_s22 = int_to_ptr.hbm [resolvable:$true] %s55_s22 }
   0xd   :  { %s53_s19 = sshll.u32 %s151_s0, 4  ;;  %s54_s19 = int_to_ptr.vmem [resolvable:$true] %s53_s19 }
   0xe   :  { %v46_v4 = vmul.f32 %v70_v2, %v44_v3 }
  0x10   :  { %47 = vst [vmem:[#allocation7] sm:$0xf] %v46_v4 }
  0x11   :  { %58 = dma.vmem_to_hbm [thread:$0]  %s54_s19, 64, %s56_s22, [#allocation4]  }
  0x12   :  { %147 = dma.done.wait [#allocation4], 64  }
  0x13   :  { %148 = vsyncadd [#allocation4], 4294967232 }
  0x14   :  { %63 = vsyncpa [#allocation3], 1 }
  0x15   :  { %64 = vsyncpa [#allocation6], 1 }
  0x16   :  { %65 = vsyncpa [#allocation4], 1 }

</bundles_post_ra>
